<compile_context>
chip_gen: v7x
topology: tpu7x:2x2x1
jax: 0.10.0
libtpu: 0.0.40
codegen_flags: <defaults>
</compile_context>

<pallas_src>
import functools
import math

import jax
import jax.numpy as jnp
from jax.experimental import pallas as pl
from jax.experimental.pallas import tpu as pltpu


_TAPS3 = [(kh, kw) for kh in range(3) for kw in range(3)]
_TAPS5 = [(kh, kw) for kh in range(5) for kw in range(5)]
_NEIGHBOR_OFFSETS = [(a, b) for a in (-1, 0, 1) for b in (-1, 0, 1)
                     if not (a == 0 and b == 0)]
_CIN = 5        # channels fed to conv1 (x, prev, bin(prev), prob-step, bin-step)
_CIN_PAD = 8    # per-tap channel count in the conv1 im2col buffer (zero padded)
_K1 = len(_TAPS5) * _CIN_PAD   # 200 real contraction rows for conv1
_K1_PAD = 256                  # lane-aligned padded contraction dim (safe)


# ---------------------------------------------------------------------------
# One-time probe of pltpu.roll's rotation direction (documented to match
# jnp.roll; verified once on-device so the main kernel is correct either way).
# ---------------------------------------------------------------------------
@functools.lru_cache(maxsize=None)
def _roll_matches_jnp():
    x = jnp.arange(8 * 128, dtype=jnp.float32).reshape(8, 128)

    def k(x_ref, o_ref):
        o_ref[...] = pltpu.roll(x_ref[...], 1, axis=1)

    y = pl.pallas_call(
        k, out_shape=jax.ShapeDtypeStruct((8, 128), jnp.float32))(x)
    return bool(jnp.array_equal(y, jnp.roll(x, 1, axis=1)))


# ---------------------------------------------------------------------------
# Fully fused kernel: preprocess + conv1..conv4, looped n_it times in-kernel.
# Layout inside the kernel: (channels, H*W) with the H*W pixels in lanes.
# ---------------------------------------------------------------------------
def _fused_kernel(x_ref, w1_ref, b1_ref, w2_ref, b2_ref, w3_ref, b3_ref,
                  w4_ref, b4_ref, o_ref, c5_ref, im1_ref, im2_ref,
                  *, n_it, grid_w, roll_like_jnp):
    f32 = jnp.float32
    bf16 = jnp.bfloat16
    npix = x_ref.shape[-1]                 # H * W
    C = w2_ref.shape[0] // 3               # conv channel count (256)

    # lane index -> column (w) of the pixel; used to fix wrap-around of the
    # flattened circular column shifts at the W boundary.
    w_idx = jax.lax.broadcasted_iota(jnp.int32, (1, npix), 1) % grid_w
    bad = {
        1: w_idx >= (grid_w - 1),
        2: w_idx >= (grid_w - 2),
        -1: w_idx < 1,
        -2: w_idx < 2,
    }

    def flat_shift(v, s):
        # result[:, p] = v[:, (p + s) mod npix]   (lane-dim circular shift)
        s = s % npix
        if s == 0:
            return v
        if v.shape[0] >= 8:
            # XLU rotate; direction chosen per the one-time probe.
            amt = (npix - s) if roll_like_jnp else s
            return pltpu.roll(v, amt, axis=1)
        return jnp.concatenate([v[:, s:], v[:, :s]], axis=1)

    def col_shift(v, b):
        # u[:, h*W + w] = v[:, h*W + (w+b) mod W]
        if b == 0:
            return v
        main = flat_shift(v, b)
        alt = flat_shift(v, b - grid_w if b > 0 else b + grid_w)
        return jnp.where(bad[b], alt, main)

    def row_shift(v, a):
        # u[:, h*W + w] = v[:, ((h+a) mod H)*W + w]  (pure flat roll)
        return flat_shift(v, a * grid_w)

    def spatial_shift_small(v, a, b):
        # combined single-roll + wrap fix; used only on tiny (1, npix) rows
        main = flat_shift(v, grid_w * a + b)
        if b == 0:
            return main
        alt = flat_shift(v, grid_w * a + b - (grid_w if b > 0 else -grid_w))
        return jnp.where(bad[b], alt, main)

    # zero the padding rows of the persistent scratch (once per grid step)
    c5_ref[_CIN:_CIN_PAD, :] = jnp.zeros((_CIN_PAD - _CIN, npix), f32)
    im1_ref[_K1:_K1_PAD, :] = jnp.zeros((_K1_PAD - _K1, npix), f32)

    x_flat = x_ref[0]                                     # (1, npix) f32

    def body(_, prev):
        # -------- Game-of-Life preprocessing (kept in f32) -----------------
        nbs = [spatial_shift_small(prev, a, b) for a, b in _NEIGHBOR_OFFSETS]
        prev_bin = prev > 0.5
        nsum = sum((nb > 0.5).astype(f32) for nb in nbs)
        bin_new = jnp.logical_or(
            nsum == 3.0, jnp.logical_and(prev_bin, nsum == 2.0)).astype(f32)

        # Poisson-binomial DP: P(exactly 2)/P(exactly 3) of 8 indep. neighbors
        e0 = jnp.ones_like(prev)
        e1 = jnp.zeros_like(prev)
        e2 = jnp.zeros_like(prev)
        e3 = jnp.zeros_like(prev)
        for nb in nbs:
            q = 1.0 - nb
            e3 = e3 * q + e2 * nb
            e2 = e2 * q + e1 * nb
            e1 = e1 * q + e0 * nb
            e0 = e0 * q
        prob = e3 + e2 * prev

        c5_ref[0:1, :] = x_flat
        c5_ref[1:2, :] = prev
        c5_ref[2:3, :] = prev_bin.astype(f32)
        c5_ref[3:4, :] = prob
        c5_ref[4:5, :] = bin_new
        c5 = c5_ref[...]                                   # (8, npix) f32

        # -------- conv1: 5x5 circular as ONE im2col matmul ------------------
        # 5 column-shift variants, then pure row rolls per tap (no wrap fix).
        cvars1 = [col_shift(c5, kw - 2) for kw in range(5)]
        for t, (kh, kw) in enumerate(_TAPS5):
            im1_ref[t * _CIN_PAD:(t + 1) * _CIN_PAD, :] = (
                row_shift(cvars1[kw], kh - 2))
        acc1 = jnp.dot(w1_ref[...], im1_ref[...].astype(bf16),
                       preferred_element_type=f32)
        act1 = jnp.maximum(acc1 + b1_ref[...], 0.0)        # (C, npix) f32

        # -------- conv2: 3x3 circular as ONE (3C,3C)x(3C,npix) matmul -------
        # im2col holds only the 3 column variants (bf16); the 3 row shifts are
        # applied to the matmul OUTPUT blocks (shift commutes with the
        # channel-mixing matmul), so all K accumulation stays inside the MXU.
        im2_ref[0:C, :] = col_shift(act1, -1).astype(bf16)         # kw = 0
        im2_ref[C:2 * C, :] = act1.astype(bf16)                    # kw = 1
        im2_ref[2 * C:3 * C, :] = col_shift(act1, 1).astype(bf16)  # kw = 2
        y2 = jnp.dot(w2_ref[...], im2_ref[...],
                     preferred_element_type=f32)           # (3C, npix) f32
        acc2 = (row_shift(y2[0:C], -1)                     # kh = 0 -> a = -1
                + y2[C:2 * C]                              # kh = 1 -> a =  0
                + row_shift(y2[2 * C:3 * C], 1))           # kh = 2 -> a = +1
        act2 = jnp.maximum(acc2 + b2_ref[...], 0.0).astype(bf16)

        # -------- conv3: 1x1 -------------------------------------------------
        acc3 = jnp.dot(w3_ref[...], act2, preferred_element_type=f32)
        act3 = jnp.maximum(acc3 + b3_ref[...], 0.0).astype(bf16)

        # -------- conv4: 3x3 circular, Cout=1 --------------------------------
        # one (16,C)x(C,npix) matmul (tap-stacked weights), then shift+sum rows
        y4 = jnp.dot(w4_ref[...], act3, preferred_element_type=f32)  # (16,npix)
        acc4 = jnp.zeros((1, npix), f32)
        for t, (kh, kw) in enumerate(_TAPS3):
            acc4 = acc4 + spatial_shift_small(y4[t:t + 1, :], kh - 1, kw - 1)
        return jax.nn.sigmoid(acc4 + b4_ref[...])          # (1, npix) f32

    prev_final = jax.lax.fori_loop(0, n_it, body, x_flat)
    o_ref[0] = prev_final


# ---------------------------------------------------------------------------
# Weight packing (PyTorch OIHW conv weights -> kernel layouts, bf16)
# ---------------------------------------------------------------------------
def _pack_params(params):
    bf16 = jnp.bfloat16
    f32 = jnp.float32
    w1, b1 = params["w1"], params["b1"]     # (C, 5, 5, 5), (C,)
    w2, b2 = params["w2"], params["b2"]     # (C, C, 3, 3), (C,)
    w3, b3 = params["w3"], params["b3"]     # (C, C, 1, 1), (C,)
    w4, b4 = params["w4"], params["b4"]     # (1, C, 3, 3), (1,)
    cout = w1.shape[0]
    cin = w2.shape[1]

    # conv1 -> (C, 200) zero padded to (C, 256); column = (kh*5+kw)*8 + ci
    w1t = jnp.transpose(w1, (0, 2, 3, 1))                        # (co,kh,kw,ci)
    w1t = jnp.pad(w1t, ((0, 0), (0, 0), (0, 0), (0, _CIN_PAD - _CIN)))
    w1t = w1t.reshape(cout, _K1)
    w1p = jnp.pad(w1t, ((0, 0), (0, _K1_PAD - _K1))).astype(bf16)

    # conv2 -> (3*Cout, 3*Cin): row = kh*Cout + o, col = kw*Cin + c
    w2p = jnp.transpose(w2, (2, 0, 3, 1)).reshape(3 * cout, 3 * cin).astype(bf16)

    # conv3 -> (Cout, Cin)
    w3p = w3[:, :, 0, 0].astype(bf16)

    # conv4 -> (9, Cin) padded to (16, Cin); row = kh*3 + kw
    w4p = jnp.transpose(w4[0], (1, 2, 0)).reshape(9, cin)
    w4p = jnp.pad(w4p, ((0, 16 - 9), (0, 0))).astype(bf16)

    return (w1p, b1.reshape(cout, 1).astype(f32),
            w2p, b2.reshape(cout, 1).astype(f32),
            w3p, b3.reshape(cout, 1).astype(f32),
            w4p, b4.reshape(1, 1).astype(f32))


@functools.partial(jax.jit, static_argnames=("n_it", "roll_like_jnp"))
def _model_forward_impl(x_nchw, params, n_it, roll_like_jnp):
    B, _, H, W = x_nchw.shape
    npix = H * W
    x_flat = x_nchw.astype(jnp.float32).reshape(B, 1, npix)
    w1p, b1c, w2p, b2c, w3p, b3c, w4p, b4c = _pack_params(params)
    C = w3p.shape[0]

    kernel = functools.partial(_fused_kernel, n_it=n_it, grid_w=W,
                               roll_like_jnp=roll_like_jnp)
    out = pl.pallas_call(
        kernel,
        out_shape=jax.ShapeDtypeStruct((B, 1, npix), jnp.float32),
        grid=(B,),
        in_specs=[
            pl.BlockSpec((1, 1, npix), lambda b: (b, 0, 0)),      # x
            pl.BlockSpec(w1p.shape, lambda b: (0, 0)),            # w1 (C,256)
            pl.BlockSpec(b1c.shape, lambda b: (0, 0)),
            pl.BlockSpec(w2p.shape, lambda b: (0, 0)),            # w2 (3C,3C)
            pl.BlockSpec(b2c.shape, lambda b: (0, 0)),
            pl.BlockSpec(w3p.shape, lambda b: (0, 0)),            # w3 (C,C)
            pl.BlockSpec(b3c.shape, lambda b: (0, 0)),
            pl.BlockSpec(w4p.shape, lambda b: (0, 0)),            # w4 (16,C)
            pl.BlockSpec(b4c.shape, lambda b: (0, 0)),
        ],
        out_specs=pl.BlockSpec((1, 1, npix), lambda b: (b, 0, 0)),
        scratch_shapes=[
            pltpu.VMEM((_CIN_PAD, npix), jnp.float32),    # 5-channel stack
            pltpu.VMEM((_K1_PAD, npix), jnp.float32),     # conv1 im2col (f32)
            pltpu.VMEM((3 * C, npix), jnp.bfloat16),      # conv2 im2col (bf16)
        ],
        compiler_params=pltpu.CompilerParams(
            dimension_semantics=("parallel",),
            vmem_limit_bytes=32 * 1024 * 1024,
        ),
    )(x_flat, w1p, b1c, w2p, b2c, w3p, b3c, w4p, b4c)
    return out.reshape(B, 1, H, W)


def model_forward(x_nchw, params, n_it=5):
    """x_nchw: (B, 1, H, W) float32 in [0, 1] -> (B, 1, H, W) float32."""
    return _model_forward_impl(x_nchw, params, n_it, _roll_matches_jnp())


# ---------------------------------------------------------------------------
# Pure-JAX reference (mirrors the kernel's bf16 matmul-input precision)
# ---------------------------------------------------------------------------
def _reference_forward(x_nchw, params, n_it=5):
    f32 = jnp.float32
    x = x_nchw[:, 0].astype(f32)                       # (B, H, W)
    B, H, W = x.shape
    hi = jax.lax.Precision.HIGHEST

    def neighbors(g):
        return [jnp.roll(jnp.roll(g, -a, axis=1), -b, axis=2)
                for a, b in _NEIGHBOR_OFFSETS]

    def conv_circ(act, w, b, pad):
        act_b = act.astype(jnp.bfloat16).astype(f32)
        w_b = w.astype(jnp.bfloat16).astype(f32)
        K = w.shape[-1]
        out = jnp.zeros((B, w.shape[0], H, W), f32) + b[None, :, None, None]
        for kh in range(K):
            for kw in range(K):
                sh = jnp.roll(jnp.roll(act_b, -(kh - pad), axis=2),
                              -(kw - pad), axis=3)
                out = out + jnp.einsum("bchw,oc->bohw", sh,
                                       w_b[:, :, kh, kw], precision=hi)
        return out

    def fix_block(prev):
        nbs = neighbors(prev)
        prev_bin = prev > 0.5
        nsum = sum((nb > 0.5).astype(f32) for nb in nbs)
        bin_new = jnp.logical_or(
            nsum == 3.0, jnp.logical_and(prev_bin, nsum == 2.0)).astype(f32)
        e0 = jnp.ones_like(prev)
        e1 = jnp.zeros_like(prev)
        e2 = jnp.zeros_like(prev)
        e3 = jnp.zeros_like(prev)
        for nb in nbs:
            q = 1.0 - nb
            e3 = e3 * q + e2 * nb
            e2 = e2 * q + e1 * nb
            e1 = e1 * q + e0 * nb
            e0 = e0 * q
        prob = e3 + e2 * prev
        feats = jnp.stack([x, prev, prev_bin.astype(f32), prob, bin_new],
                          axis=1)
        h1 = jax.nn.relu(conv_circ(feats, params["w1"], params["b1"], 2))
        h2 = jax.nn.relu(conv_circ(h1, params["w2"], params["b2"], 1))
        h3 = jax.nn.relu(conv_circ(h2, params["w3"], params["b3"], 0))
        h4 = jax.nn.sigmoid(conv_circ(h3, params["w4"], params["b4"], 1))
        return h4[:, 0]

    prev = x
    for _ in range(n_it):
        prev = fix_block(prev)
    return prev[:, None]


# ---------------------------------------------------------------------------
# Parameter init (PyTorch-like layouts / scales)
# ---------------------------------------------------------------------------
def init_params(key, channels=256):
    def conv_init(k, cout, cin, ksz):
        bound = 1.0 / math.sqrt(cin * ksz * ksz)
        kw_, kb_ = jax.random.split(k)
        w = jax.random.uniform(kw_, (cout, cin, ksz, ksz), jnp.float32,
                               -bound, bound)
        b = jax.random.uniform(kb_, (cout,), jnp.float32, -bound, bound)
        return w, b

    k1, k2, k3, k4 = jax.random.split(key, 4)
    w1, b1 = conv_init(k1, channels, 5, 5)
    w2, b2 = conv_init(k2, channels, channels, 3)
    w3, b3 = conv_init(k3, channels, channels, 1)
    w4, b4 = conv_init(k4, 1, channels, 3)
    return {"w1": w1, "b1": b1, "w2": w2, "b2": b2,
            "w3": w3, "b3": b3, "w4": w4, "b4": b4}


if __name__ == "__main__":
    key = jax.random.PRNGKey(0)
    k_x, k_p = jax.random.split(key)

    B, H, W = 2, 16, 16
    x = jax.random.uniform(k_x, (B, 1, H, W), dtype=jnp.float32)
    params = init_params(k_p, channels=256)

    y = jax.block_until_ready(model_forward(x, params, n_it=5))
    assert y.shape == (B, 1, H, W), y.shape
    assert bool(jnp.all(jnp.isfinite(y)))
    assert bool(jnp.all((y >= 0.0) & (y <= 1.0)))   # sigmoid output

    y_ref = jax.block_until_ready(
        jax.jit(_reference_forward, static_argnames=("n_it",))(x, params,
                                                                n_it=5))
    max_err = float(jnp.max(jnp.abs(y - y_ref)))
    assert max_err < 1e-2, f"max abs err vs reference: {max_err}"

    print("KERNEL_OK")
</pallas_src>

<mosaic_0001>
module attributes {stable_mosaic.version = 11 : i64} {
  func.func @k(%arg0: memref<8x128xf32, #tpu.memory_space<vmem>>, %arg1: memref<8x128xf32, #tpu.memory_space<vmem>>) attributes {dimension_semantics = [], scalar_prefetch = 0 : i64, scratch_operands = 0 : i64, tpu.core_type = #tpu.core_type<tc>} {
    %c0 = arith.constant 0 : index
    %c0_0 = arith.constant 0 : index
    %0 = vector.load %arg0[%c0, %c0_0] : memref<8x128xf32, #tpu.memory_space<vmem>>, vector<8x128xf32>
    %c1_i32 = arith.constant 1 : i32
    %1 = tpu.dynamic_rotate %0 by %c1_i32 dim 1 : vector<8x128xf32>, i32 -> vector<8x128xf32>
    %c0_1 = arith.constant 0 : index
    %c0_2 = arith.constant 0 : index
    %2 = vector.load %arg1[%c0_1, %c0_2] : memref<8x128xf32, #tpu.memory_space<vmem>>, vector<8x128xf32>
    tpu.vector_store %arg1[%c0_1, %c0_2], %1 {strides = array<i32>} : memref<8x128xf32, #tpu.memory_space<vmem>>, vector<8x128xf32>,
    return
  }
}

</mosaic_0001>

<bundles_post_ra>
// kernel: tpu_custom_call.1
= control target key start
LH: loop header
LB: loop body
LE: loop exit
PB: predicated region body
PF: predicated region fallthrough
CT: control target
= control target key end

     0   :  { %6 = vsyncpa [#allocation3], 0  ;;  %s128_s0 = inlined_call_operand.hbm [shape: f32[8,128], index: 0, kind: input, shape index: {}]   ;;  %s129_s1 = inlined_call_operand.hbm [shape: f32[8,128], index: 1, kind: output, shape index: {}]  }
   0x1   :  { %7 = vsyncpa [#allocation4], 0  ;;  %s91_s6 = smov [#allocation2]   ;;  %s43_s10 = scalar_lea.hbm %s128_s0, 128 }
   0x2   :  { %s14_s7 = sshll.u32 %s91_s6, 4  ;;  %p44_p0 = scmp.ne.s32.totalorder %s128_s0, %s43_s10  ;;  %s15_s7 = int_to_ptr.vmem [resolvable:$true] %s14_s7 }
   0x3   :  { %p47_p1 = scmp.lt.u32.totalorder %s43_s10, %s128_s0 }
   0x5   :  { %p49_p2 = pnand %p47_p1, %p44_p0 }
   0x7   :  { %52 = shalt.err (!%p49_p2)
}
   0x8   :  { %s53_s15 = scalar_lea.vmem %s15_s7, 128  ;;  %p58_p4 = scmp.lt.s32.totalorder %s15_s7, %s15_s7 }
   0x9   :  { %p54_p3 = scmp.ne.s32.totalorder %s15_s7, %s53_s15  ;;  %p59_p5 = scmp.lt.s32.totalorder %s53_s15, %s53_s15 }
   0xb   :  { %p60_p6 = por %p59_p5, %p58_p4 }
   0xd   :  { %p61_p7 = pnand %p60_p6, %p54_p3 }
   0xf   :  { %64 = shalt.err (!%p61_p7)
}
  0x10   :  { %17 = dma.hbm_to_vmem [thread:$0]  %s128_s0, 128, %s15_s7, [#allocation3]  }
  0x11   :  { %87 = dma.done.wait [#allocation3], 128  }
  0x12   :  { %88 = vsyncadd [#allocation3], 4294967168  ;;  %v21_v0 = vld [vmem:[#allocation2] sm:$0xff]  ;;  %s92_s18 = smov 1   ;;  %s93_s19 = smov [#allocation5]  }
  0x13   :  { %22 = vrot.lane.b32.xlu0 %v21_v0, %s92_s18  ;;  %s31_s20 = sshll.u32 %s93_s19, 4  ;;  %s32_s20 = int_to_ptr.vmem [resolvable:$true] %s31_s20 }
  0x14   :  { %s65_s21 = scalar_lea.vmem %s32_s20, 128  ;;  %p70_p9 = scmp.lt.s32.totalorder %s32_s20, %s32_s20 }
  0x15   :  { %p66_p8 = scmp.ne.s32.totalorder %s32_s20, %s65_s21  ;;  %p71_p10 = scmp.lt.s32.totalorder %s65_s21, %s65_s21 }
  0x17   :  { %p72_p11 = por %p71_p10, %p70_p9 }
  0x19   :  { %p73_p12 = pnand %p72_p11, %p66_p8 }
  0x85   :  { %v23_v1 = vpop.permute.xlu0 %22 }
  0x86   :  { %24 = vst [vmem:[#allocation5] sm:$0xff] %v23_v1 }
  0x87   :  { %76 = shalt.err (!%p73_p12)
}
  0x88   :  { %s77_s0 = scalar_lea.hbm %s129_s1, 128 }
  0x89   :  { %p78_p13 = scmp.ne.s32.totalorder %s129_s1, %s77_s0  ;;  %p81_p0 = scmp.lt.u32.totalorder %s77_s0, %s129_s1 }
  0x8b   :  { %p83_p1 = pnand %p81_p0, %p78_p13 }
  0x8d   :  { %86 = shalt.err (!%p83_p1)
}
  0x8e   :  { %34 = dma.vmem_to_hbm [thread:$0]  %s32_s20, 128, %s129_s1, [#allocation4]  }
  0x8f   :  { %89 = dma.done.wait [#allocation4], 128  }
  0x90   :  { %90 = vsyncadd [#allocation4], 4294967168 }
  0x91   :  { %38 = vsyncpa [#allocation3], 1 }
  0x92   :  { %39 = vsyncpa [#allocation4], 1 }

</bundles_post_ra>
